<compile_context>
chip_gen: v5e
topology: v5e:2x2
jax: 0.10.0
libtpu: 0.0.40
codegen_flags: <defaults>
</compile_context>

<pallas_src>
import jax
import jax.numpy as jnp
from jax import lax
from jax.experimental import pallas as pl
from jax.experimental.pallas import tpu as pltpu


def linear_softmax_kernel(x_ref, w_ref, b_ref, o_ref):
    # x: [B, In], w: [In, Out] (pre-transposed at init), b: [1, Out], o: [B, Out]
    x = x_ref[...]
    w = w_ref[...]
    b = b_ref[...]

    # Canonical [B,K] x [K,N] matmul on the MXU with f32 accumulation.
    logits = lax.dot_general(
        x, w,
        dimension_numbers=(((1,), (0,)), ((), ())),
        preferred_element_type=jnp.float32,
    ) + b

    # Numerically-stable softmax over the last (lane) axis == PyTorch dim=1.
    m = jnp.max(logits, axis=-1, keepdims=True)
    e = jnp.exp(logits - m)
    denom = jnp.sum(e, axis=-1, keepdims=True)
    o_ref[...] = (e / denom).astype(o_ref.dtype)


def make_model_forward(batch, input_size, output_size, dtype=jnp.float32):
    """Builds the jitted forward: (data[B,In], weight_t[In,Out], bias2d[1,Out])."""
    itemsize = jnp.dtype(dtype).itemsize
    cost = pl.CostEstimate(
        flops=2 * batch * input_size * output_size,
        transcendentals=batch * output_size,
        bytes_accessed=itemsize * (batch * input_size
                                   + input_size * output_size
                                   + output_size
                                   + batch * output_size),
    )

    call = pl.pallas_call(
        linear_softmax_kernel,
        out_shape=jax.ShapeDtypeStruct((batch, output_size), dtype),
        # Gridless call: whole arrays resident in VMEM, no pipeline machinery.
        # TODO(synk): for large B on v7x, switch to a grid over B with
        # dimension_semantics=("parallel",) to use both TensorCores.
        in_specs=[
            pl.BlockSpec(memory_space=pltpu.MemorySpace.VMEM),  # data   [B, In]
            pl.BlockSpec(memory_space=pltpu.MemorySpace.VMEM),  # weight [In, Out]
            pl.BlockSpec(memory_space=pltpu.MemorySpace.VMEM),  # bias   [1, Out]
        ],
        out_specs=pl.BlockSpec(memory_space=pltpu.MemorySpace.VMEM),
        cost_estimate=cost,
    )

    @jax.jit
    def model_forward(data, weight_t, bias_2d):
        return call(data, weight_t, bias_2d)

    return model_forward


if __name__ == "__main__":
    key = jax.random.PRNGKey(0)
    k_x, k_w, k_b = jax.random.split(key, 3)

    batch, input_size, output_size = 8, 32, 16

    # Deterministic parameter init (mimics nn.Linear's uniform(-1/sqrt(In), 1/sqrt(In)))
    bound = 1.0 / (input_size ** 0.5)
    weight = jax.random.uniform(k_w, (output_size, input_size),
                                minval=-bound, maxval=bound, dtype=jnp.float32)
    bias = jax.random.uniform(k_b, (output_size,),
                              minval=-bound, maxval=bound, dtype=jnp.float32)
    data = jax.random.normal(k_x, (batch, input_size), dtype=jnp.float32)

    # One-time (init-time) layout prep — NOT on the per-call hot path.
    weight_t = jnp.asarray(weight.T)          # [In, Out]
    bias_2d = bias.reshape(1, output_size)    # [1, Out]

    model_forward = make_model_forward(batch, input_size, output_size)

    out = model_forward(data, weight_t, bias_2d)
    jax.block_until_ready(out)

    # Reference check in plain JAX.
    ref = jax.nn.softmax(data @ weight.T + bias, axis=1)
    assert out.shape == (batch, output_size)
    assert jnp.allclose(out, ref, atol=1e-5, rtol=1e-5)
    assert jnp.allclose(jnp.sum(out, axis=1), 1.0, atol=1e-5)

    print("KERNEL_OK")
</pallas_src>

<mosaic_0001>
module attributes {stable_mosaic.version = 11 : i64} {
  func.func @linear_softmax_kernel(%arg0: memref<8x32xf32, #tpu.memory_space<vmem>>, %arg1: memref<32x16xf32, #tpu.memory_space<vmem>>, %arg2: memref<1x16xf32, #tpu.memory_space<vmem>>, %arg3: memref<8x16xf32, #tpu.memory_space<vmem>>) attributes {dimension_semantics = [], scalar_prefetch = 0 : i64, scratch_operands = 0 : i64, tpu.core_type = #tpu.core_type<tc>} {
    %c0 = arith.constant 0 : index
    %c0_0 = arith.constant 0 : index
    %0 = vector.load %arg0[%c0, %c0_0] : memref<8x32xf32, #tpu.memory_space<vmem>>, vector<8x32xf32>
    %c0_1 = arith.constant 0 : index
    %c0_2 = arith.constant 0 : index
    %1 = vector.load %arg1[%c0_1, %c0_2] : memref<32x16xf32, #tpu.memory_space<vmem>>, vector<32x16xf32>
    %c0_3 = arith.constant 0 : index
    %c0_4 = arith.constant 0 : index
    %2 = vector.load %arg2[%c0_3, %c0_4] : memref<1x16xf32, #tpu.memory_space<vmem>>, vector<1x16xf32>
    %cst = arith.constant dense<0.000000e+00> : vector<8x16xf32>
    %3 = tpu.matmul %0, %1, %cst {dimension_numbers = #tpu.dot_dimension_numbers<[1], [0], [0], [1], [0, 0, 1, 1], [], []>} : vector<8x32xf32>, vector<32x16xf32>, vector<8x16xf32> -> vector<8x16xf32>
    %4 = vector.broadcast %2 : vector<1x16xf32> to vector<8x16xf32>
    %5 = arith.addf %3, %4 : vector<8x16xf32>
    %cst_5 = arith.constant dense<0xFF800000> : vector<8xf32>
    %6 = vector.multi_reduction <maximumf>, %5, %cst_5 [1] : vector<8x16xf32> to vector<8xf32>
    %7 = vector.shape_cast %6 : vector<8xf32> to vector<8x1xf32>
    %8 = vector.broadcast %7 : vector<8x1xf32> to vector<8x16xf32>
    %9 = arith.subf %5, %8 : vector<8x16xf32>
    %10 = math.exp %9 : vector<8x16xf32>
    %cst_6 = arith.constant dense<0.000000e+00> : vector<8xf32>
    %11 = vector.multi_reduction <add>, %10, %cst_6 [1] : vector<8x16xf32> to vector<8xf32>
    %12 = vector.shape_cast %11 : vector<8xf32> to vector<8x1xf32>
    %13 = vector.broadcast %12 : vector<8x1xf32> to vector<8x16xf32>
    %14 = arith.divf %10, %13 : vector<8x16xf32>
    %c0_7 = arith.constant 0 : index
    %c0_8 = arith.constant 0 : index
    %15 = vector.load %arg3[%c0_7, %c0_8] : memref<8x16xf32, #tpu.memory_space<vmem>>, vector<8x16xf32>
    tpu.vector_store %arg3[%c0_7, %c0_8], %14 {strides = array<i32>} : memref<8x16xf32, #tpu.memory_space<vmem>>, vector<8x16xf32>,
    return
  }
}

</mosaic_0001>

<bundles_post_ra>
// kernel: model_forward.1
= control target key start
LH: loop header
LB: loop body
LE: loop exit
PB: predicated region body
PF: predicated region fallthrough
CT: control target
= control target key end

     0   :  { %s168_s0 = inlined_call_operand.vmem [shape: f32[8,32], index: 0, kind: input, shape index: {}]   ;;  %s169_s1 = inlined_call_operand.vmem [shape: f32[32,16], index: 1, kind: input, shape index: {}]   ;;  %s170_s2 = inlined_call_operand.vmem [shape: f32[1,16], index: 2, kind: input, shape index: {}]   ;;  %s171_s3 = inlined_call_operand.hbm [shape: f32[8,16], index: 3, kind: output, shape index: {}]  }
   0x1   :  { %v19_v0 = vld [vmem:[%s169_s1 + $0x18] sm:$0xff]  ;;  %v18_v1 = vld [vmem:[%s169_s1 + $0x10] sm:$0xff]  ;;  %v17_v2 = vld [vmem:[%s169_s1 + $0x8] sm:$0xff] }
   0x2   :  { %40 = vmatpush.msra.mxu0 %v19_v0 }
   0x3   :  { %8 = vsyncpa [#allocation3], 0  ;;  %v16_v3 = vld [vmem:[%s169_s1] sm:$0xff]  ;;  %vm24_vm0 = vcmask 261120   ;;  %vm48_vm1 = vcmask 130048   ;;  %s81_s25 = sshll.u32 %s171_s3, 4  ;;  %s82_s25 = int_to_ptr.hbm [resolvable:$true] %s81_s25 }
   0x4   :  { %41 = vmatpush.msra.mxu0 %v18_v1  ;;  %v15_v4 = vld [vmem:[%s168_s0] sm:$0xff]  ;;  %s123_s0 = smov [#allocation2]  }
   0x5   :  { %v92_v5 = vld [vmem:[%s170_s2] ss:$0 sm:$0xff]  ;;  %s79_s1 = sshll.u32 %s123_s0, 4  ;;  %s80_s1 = int_to_ptr.vmem [resolvable:$true] %s79_s1 }
   0x6   :  { %42 = vmatpush.msra.mxu0 %v17_v2 }
   0x8   :  { %43 = vmatpush.msra.mxu0 %v16_v3 }
   0x9   :  { %90 = vmatmul.msk.f32.vlgmr.msra.gmra.mxu0 %vm24_vm0, %v15_v4 }
  0x86   :  { %v45_v6 = vpop.f32.mrf.mxu0 }
  0x87   :  { %v46_v7 = vadd.f32 %v92_v5, %v45_v6 }
  0x89   :  { %v49_v8 = vsel %vm48_vm1, %v46_v7, -inf }
  0x8a   :  { %50 = vmax.xlane.f32.xlu0 %v49_v8 }
  0xfd   :  { %v51_v9 = vpop.xlane.xlu0 %50 }
  0xfe   :  { %v52_v10 = vsub.f32 %v46_v7, %v51_v9 }
 0x100   :  { %v53_v11 = vmul.f32 1.442695, %v52_v10 }
 0x102   :  { %93 = vpow2.f32 %v53_v11 }
 0x108   :  { %v94_v12 = vpop.eup %93 }
 0x109   :  { %v55_v13 = vsel %vm48_vm1, %v94_v12, 0.0 }
 0x10a   :  { %56 = vadd.xlane.f32.xlu0 %v55_v13 }
 0x17d   :  { %v57_v14 = vpop.xlane.xlu0 %56 }
 0x17e   :  { %95 = vrcp.f32 %v57_v14  ;;  %v69_v18 = vand.u32 2147483648, %v57_v14  ;;  %v67_v20 = vand.u32 2147483647, %v57_v14  ;;  %vm63_vm3 = vweird.f32 %v57_v14 }
 0x180   :  { %v70_v22 = vor.u32 1.1754944e-38, %v69_v18  ;;  %vm68_vm5 = vcmp.eq.f32.partialorder %v67_v20, 8.507059e+37 }
 0x184   :  { %v96_v15 = vpop.eup %95 }
 0x185   :  { %v59_v16 = vmul.f32 %v96_v15, %v57_v14  ;;  %vm64_vm2 = vweird.f32 %v96_v15 }
 0x186   :  { %vm65_vm4 = vmor %vm63_vm3, %vm64_vm2 }
 0x187   :  { %v60_v17 = vsub.f32 1.0, %v59_v16 }
 0x189   :  { %v61_v19 = vmul.f32 %v96_v15, %v60_v17 }
 0x18b   :  { %v62_v21 = vadd.f32 %v96_v15, %v61_v19 }
 0x18d   :  { %v66_v23 = vsel %vm65_vm4, %v96_v15, %v62_v21 }
 0x18e   :  { %v71_v24 = vsel %vm68_vm5, %v70_v22, %v66_v23 }
 0x18f   :  { %v72_v25 = vmul.f32 %v94_v12, %v71_v24 }
 0x191   :  { %73 = vst.msk [vmem:[#allocation2] sm:$0xff] %vm48_vm1, %v72_v25 }
 0x192   :  { %84 = dma.vmem_to_hbm [thread:$0]  %s80_s1, 128, %s82_s25, [#allocation3]  }
 0x193   :  { %121 = dma.done.wait [#allocation3], 128  }
 0x194   :  { %122 = vsyncadd [#allocation3], 4294967168 }
 0x195   :  { %89 = vsyncpa [#allocation3], 1 }

</bundles_post_ra>
